<compile_context>
chip_gen: v7x
topology: tpu7x:2x2x1
jax: 0.10.0
libtpu: 0.0.40
codegen_flags: <defaults>
</compile_context>

<pallas_src>
import jax
import jax.numpy as jnp
from jax import lax
from jax.experimental import pallas as pl
from jax.experimental.pallas import tpu as pltpu

EPS = 1e-5
_HIGHEST = lax.Precision.HIGHEST


# ----------------------------- small helpers -------------------------------

def _sigmoid(x):
    return 1.0 / (1.0 + jnp.exp(-x))


def _swish(x):
    return x * _sigmoid(x)


def _layer_norm(x, g, b, eps=EPS):
    mu = jnp.mean(x, axis=-1, keepdims=True)
    var = jnp.mean(jnp.square(x - mu), axis=-1, keepdims=True)
    return (x - mu) * lax.rsqrt(var + eps) * g + b


def _mm(a, b):
    # a @ b (contract a[-1] with b[0]) on the MXU, f32 accumulate.
    return lax.dot_general(a, b, (((1,), (0,)), ((), ())),
                           precision=_HIGHEST,
                           preferred_element_type=jnp.float32)


def _mm_t(a, b):
    # a @ b.T without materialising the transpose.
    return lax.dot_general(a, b, (((1,), (1,)), ((), ())),
                           precision=_HIGHEST,
                           preferred_element_type=jnp.float32)


def _row_tile(n_rows, target=2048):
    """Largest row tile (multiple of 8, divides n_rows) not exceeding target."""
    if n_rows <= target:
        return n_rows
    t = (target // 8) * 8
    while t >= 8:
        if n_rows % t == 0:
            return t
        t -= 8
    return n_rows


# ------------------- kernel 1/4: fused LayerNorm + FFN ----------------------

def _make_ffn_kernel(scale, with_final_ln):
    def kernel(*refs):
        if with_final_ln:
            (x_ref, g_ref, b_ref, w1_ref, b1_ref, w2_ref, b2_ref,
             fg_ref, fb_ref, o_ref) = refs
        else:
            x_ref, g_ref, b_ref, w1_ref, b1_ref, w2_ref, b2_ref, o_ref = refs
        x = x_ref[...].astype(jnp.float32)                       # (R, D)
        xn = _layer_norm(x, g_ref[...], b_ref[...])
        h = _mm(xn, w1_ref[...]) + b1_ref[...]                   # (R, F)
        h = _swish(h)                                            # Swish
        y = _mm(h, w2_ref[...]) + b2_ref[...]                    # (R, D)
        out = x + scale * y                                      # residual
        if with_final_ln:
            out = _layer_norm(out, fg_ref[...], fb_ref[...])     # norm_final fused
        o_ref[...] = out.astype(o_ref.dtype)
    return kernel


def _ffn_block(rows, ln_g, ln_b, w1, b1, w2, b2, *, scale, final_ln=None):
    R, D = rows.shape
    F = w1.shape[1]
    tile = _row_tile(R)
    grid = (R // tile,)
    weights = [ln_g, ln_b, w1, b1, w2, b2]
    if final_ln is not None:
        weights += list(final_ln)
    in_specs = ([pl.BlockSpec((tile, D), lambda i: (i, 0))]
                + [pl.BlockSpec(w.shape, lambda i: (0, 0)) for w in weights])
    cost = pl.CostEstimate(
        flops=int(4 * R * D * F),
        transcendentals=int(R * F),
        bytes_accessed=int(4 * (2 * R * D + 2 * D * F)),
    )
    return pl.pallas_call(
        _make_ffn_kernel(scale, final_ln is not None),
        out_shape=jax.ShapeDtypeStruct((R, D), rows.dtype),
        grid=grid,
        in_specs=in_specs,
        out_specs=pl.BlockSpec((tile, D), lambda i: (i, 0)),
        compiler_params=pltpu.CompilerParams(dimension_semantics=("parallel",)),
        cost_estimate=cost,
    )(rows, *weights)


# ------------- kernel 2/4: pos-emb projection (grid invariant) --------------

def _pos_proj_kernel(pe_ref, w_ref, o_ref):
    o_ref[...] = _mm(pe_ref[...].astype(jnp.float32), w_ref[...]).astype(o_ref.dtype)


def _pos_proj(pe2d, w_pos):
    N, D = pe2d.shape
    return pl.pallas_call(
        _pos_proj_kernel,
        out_shape=jax.ShapeDtypeStruct((N, D), jnp.float32),
    )(pe2d, w_pos)


# ------------- kernel 3/4: relative-position multi-head attention -----------

def _make_attention_kernel(num_heads, head_dim, seq_len):
    H, Dh, T = num_heads, head_dim, seq_len
    D = H * Dh
    scaling = float(Dh) ** -0.5

    def kernel(x_ref, p_ref, bias_ref, lng_ref, lnb_ref, win_ref, bin_ref,
               pbu_ref, pbv_ref, wout_ref, bout_ref, o_ref):
        x = x_ref[...].astype(jnp.float32)                       # (T, D) pre-norm
        xn = _layer_norm(x, lng_ref[...], lnb_ref[...])          # norm_mha
        qkv = _mm(xn, win_ref[...]) + bin_ref[...]               # (T, 3D)
        p_all = p_ref[...]                                       # (N, D) = linear_pos(pos_emb)
        u = pbu_ref[...]                                         # (H, Dh)
        vb = pbv_ref[...]                                        # (H, Dh)
        bias = bias_ref[...]                                     # (1, T) additive key mask

        ctx = []
        for h in range(H):                                       # static unroll over heads
            q_h = qkv[:, h * Dh:(h + 1) * Dh]                    # (T, Dh)
            k_h = qkv[:, D + h * Dh:D + (h + 1) * Dh]
            v_h = qkv[:, 2 * D + h * Dh:2 * D + (h + 1) * Dh]
            p_h = p_all[:, h * Dh:(h + 1) * Dh]                  # (2T-1, Dh)
            q_u = q_h + u[h:h + 1, :]
            q_v = q_h + vb[h:h + 1, :]
            ac = _mm_t(q_u, k_h)                                 # (T, T)
            bd = _mm_t(q_v, p_h)                                 # (T, 2T-1)
            # rel_shift: out[i, j] = bd[i, T-1-i+j]   (torch as_strided equivalent)
            rows = [bd[i:i + 1, T - 1 - i:2 * T - 1 - i] for i in range(T)]
            bd_shift = jnp.concatenate(rows, axis=0)             # (T, T)
            scores = (ac + bd_shift) * scaling + bias
            m = jnp.max(scores, axis=-1, keepdims=True)
            e = jnp.exp(scores - m)
            attn = e / jnp.sum(e, axis=-1, keepdims=True)        # softmax (dropout = id)
            ctx.append(_mm(attn, v_h))                           # (T, Dh)
        ctx = jnp.concatenate(ctx, axis=1)                       # (T, D)
        out = _mm(ctx, wout_ref[...]) + bout_ref[...]            # out_proj
        o_ref[...] = (x + out).astype(o_ref.dtype)               # residual fused
    return kernel


def _attention_block(x_btd, p_proj, attn_bias, ln_g, ln_b, w_in, b_in,
                     pos_bias_u, pos_bias_v, w_out, b_out, *, num_heads):
    B, T, D = x_btd.shape
    H = num_heads
    Dh = D // H
    N = p_proj.shape[0]
    weights = [ln_g, ln_b, w_in, b_in, pos_bias_u, pos_bias_v, w_out, b_out]
    in_specs = ([pl.BlockSpec((None, T, D), lambda b: (b, 0, 0)),
                 pl.BlockSpec((N, D), lambda b: (0, 0)),
                 pl.BlockSpec((None, 1, T), lambda b: (b, 0, 0))]
                + [pl.BlockSpec(w.shape, lambda b: (0, 0)) for w in weights])
    cost = pl.CostEstimate(
        flops=int(2 * B * (3 * T * D * D + H * T * T * Dh * 2 + H * T * N * Dh + T * D * D)),
        transcendentals=int(B * H * T * T),
        bytes_accessed=int(4 * (2 * B * T * D + 4 * D * D + N * D)),
    )
    return pl.pallas_call(
        _make_attention_kernel(H, Dh, T),
        out_shape=jax.ShapeDtypeStruct((B, T, D), x_btd.dtype),
        grid=(B,),
        in_specs=in_specs,
        out_specs=pl.BlockSpec((None, T, D), lambda b: (b, 0, 0)),
        compiler_params=pltpu.CompilerParams(dimension_semantics=("parallel",)),
        cost_estimate=cost,
    )(x_btd, p_proj, attn_bias, *weights)


# ---------------------- kernel 4/4: ConvolutionModule -----------------------

def _make_conv_kernel(kernel_size):
    K = kernel_size
    P = (K - 1) // 2

    def kernel(x_ref, lng_ref, lnb_ref, w1_ref, b1_ref, wdw_ref, bdw_ref,
               ng_ref, nb_ref, w2_ref, b2_ref, o_ref):
        x = x_ref[...].astype(jnp.float32)                       # (T, C) pre-norm
        T, C = x.shape
        xn = _layer_norm(x, lng_ref[...], lnb_ref[...])          # norm_conv (outer LN)
        y = _mm(xn, w1_ref[...]) + b1_ref[...]                   # pointwise_conv1 -> (T, 2C)
        g = y[:, :C] * _sigmoid(y[:, C:])                        # GLU over channels
        # depthwise conv along time, zero padding P (statically unrolled taps)
        wd = wdw_ref[...]                                        # (K, C)
        acc = jnp.zeros_like(g) + bdw_ref[...]                   # (T, C)
        for k in range(K):
            o = k - P
            if o == 0:
                shifted = g
            elif o > 0:
                shifted = jnp.concatenate(
                    [g[o:, :], jnp.zeros((o, C), jnp.float32)], axis=0)
            else:
                shifted = jnp.concatenate(
                    [jnp.zeros((-o, C), jnp.float32), g[:T + o, :]], axis=0)
            acc = acc + wd[k:k + 1, :] * shifted
        z = _layer_norm(acc, ng_ref[...], nb_ref[...])           # inner LayerNorm
        z = _swish(z)
        out = _mm(z, w2_ref[...]) + b2_ref[...]                  # pointwise_conv2
        o_ref[...] = (x + out).astype(o_ref.dtype)               # residual fused
    return kernel


def _conv_block(x_btd, ln_g, ln_b, w_pw1, b_pw1, w_dw, b_dw,
                norm_g, norm_b, w_pw2, b_pw2, *, kernel_size):
    B, T, C = x_btd.shape
    weights = [ln_g, ln_b, w_pw1, b_pw1, w_dw, b_dw, norm_g, norm_b, w_pw2, b_pw2]
    in_specs = ([pl.BlockSpec((None, T, C), lambda b: (b, 0, 0))]
                + [pl.BlockSpec(w.shape, lambda b: (0, 0)) for w in weights])
    return pl.pallas_call(
        _make_conv_kernel(kernel_size),
        out_shape=jax.ShapeDtypeStruct((B, T, C), x_btd.dtype),
        grid=(B,),
        in_specs=in_specs,
        out_specs=pl.BlockSpec((None, T, C), lambda b: (b, 0, 0)),
        compiler_params=pltpu.CompilerParams(dimension_semantics=("parallel",)),
    )(x_btd, *weights)


# ----------------------------- full layer -----------------------------------

def transformer_encoder_layer(src, pos_emb, params, key_padding_mask=None):
    """Pallas forward of the Conformer TransformerEncoderLayer (eval mode)."""
    T, B, D = src.shape
    N = pos_emb.shape[1]
    H = params["num_heads"]

    # 1. macaron feed-forward (0.5-scaled residual), fused LN + FFN, row tiled.
    rows = src.reshape(T * B, D)
    rows = _ffn_block(rows, params["ffmac_ln_g"], params["ffmac_ln_b"],
                      params["ffmac_w1"], params["ffmac_b1"],
                      params["ffmac_w2"], params["ffmac_b2"], scale=0.5)
    x_btd = jnp.transpose(rows.reshape(T, B, D), (1, 0, 2))      # (B, T, D)

    # 2. rel-pos self-attention.  Grid-invariant pos projection computed once.
    p_proj = _pos_proj(pos_emb.reshape(N, D).astype(jnp.float32), params["w_pos"])
    if key_padding_mask is None:
        attn_bias = jnp.zeros((B, 1, T), jnp.float32)
    else:
        attn_bias = jnp.where(key_padding_mask, -1e30, 0.0).astype(jnp.float32)
        attn_bias = attn_bias.reshape(B, 1, T)
    x_btd = _attention_block(x_btd, p_proj, attn_bias,
                             params["mha_ln_g"], params["mha_ln_b"],
                             params["w_in"], params["b_in"],
                             params["pos_bias_u"], params["pos_bias_v"],
                             params["w_out"], params["b_out"], num_heads=H)

    # 3. convolution module (+residual).
    x_btd = _conv_block(x_btd, params["conv_ln_g"], params["conv_ln_b"],
                        params["pw1_w"], params["pw1_b"],
                        params["dw_w"], params["dw_b"],
                        params["convnorm_g"], params["convnorm_b"],
                        params["pw2_w"], params["pw2_b"],
                        kernel_size=params["cnn_kernel"])

    # 4. final feed-forward + residual + final LayerNorm (fused), row tiled.
    rows = x_btd.reshape(B * T, D)
    rows = _ffn_block(rows, params["ff_ln_g"], params["ff_ln_b"],
                      params["ff_w1"], params["ff_b1"],
                      params["ff_w2"], params["ff_b2"], scale=1.0,
                      final_ln=(params["final_ln_g"], params["final_ln_b"]))
    return jnp.transpose(rows.reshape(B, T, D), (1, 0, 2))       # back to (T, B, D)


# --------------------------- pure-JAX reference ------------------------------

def _reference_forward(src, pos_emb, params, key_padding_mask=None):
    T, B, D = src.shape
    H = params["num_heads"]
    Dh = D // H
    K = params["cnn_kernel"]
    P = (K - 1) // 2
    N = pos_emb.shape[1]

    def mm(a, b):
        return jnp.matmul(a, b, precision=_HIGHEST)

    def ffn(x, w1, b1, w2, b2):
        h = mm(x, w1) + b1
        h = _swish(h)
        return mm(h, w2) + b2

    # 1. macaron FFN
    src = src + 0.5 * ffn(_layer_norm(src, params["ffmac_ln_g"], params["ffmac_ln_b"]),
                          params["ffmac_w1"], params["ffmac_b1"],
                          params["ffmac_w2"], params["ffmac_b2"])

    # 2. attention (mirrors the torch code)
    x = _layer_norm(src, params["mha_ln_g"], params["mha_ln_b"])
    scaling = float(Dh) ** -0.5
    qkv = mm(x, params["w_in"]) + params["b_in"]
    q, k, v = jnp.split(qkv, 3, axis=-1)
    q = q.reshape(T, B, H, Dh).transpose(1, 0, 2, 3)             # (B, T, H, Dh)
    k = k.reshape(T, B, H, Dh)
    v = v.reshape(T, B * H, Dh).transpose(1, 0, 2)               # (B*H, T, Dh)
    p = mm(pos_emb.reshape(N, D), params["w_pos"]).reshape(N, H, Dh)
    p = p.transpose(1, 2, 0)                                     # (H, Dh, N)
    q_u = (q + params["pos_bias_u"]).transpose(0, 2, 1, 3)       # (B, H, T, Dh)
    q_v = (q + params["pos_bias_v"]).transpose(0, 2, 1, 3)
    k_t = k.transpose(1, 2, 3, 0)                                # (B, H, Dh, T)
    matrix_ac = jnp.einsum("bhtd,bhdn->bhtn", q_u, k_t, precision=_HIGHEST)
    matrix_bd = jnp.einsum("bhtd,hdn->bhtn", q_v, p, precision=_HIGHEST)
    idx = (T - 1) - jnp.arange(T)[:, None] + jnp.arange(T)[None, :]
    idx = jnp.broadcast_to(idx[None, None], (B, H, T, T))
    matrix_bd = jnp.take_along_axis(matrix_bd, idx, axis=-1)     # rel_shift
    attn = (matrix_ac + matrix_bd) * scaling
    if key_padding_mask is not None:
        attn = jnp.where(key_padding_mask[:, None, None, :], -jnp.inf, attn)
    attn = jax.nn.softmax(attn, axis=-1).reshape(B * H, T, T)
    out = jnp.einsum("btk,bkd->btd", attn, v, precision=_HIGHEST)
    out = out.transpose(1, 0, 2).reshape(T, B, D)
    src = src + mm(out, params["w_out"]) + params["b_out"]

    # 3. conv module
    xc = _layer_norm(src, params["conv_ln_g"], params["conv_ln_b"]).transpose(1, 0, 2)
    y = mm(xc, params["pw1_w"]) + params["pw1_b"]
    g = y[..., :D] * _sigmoid(y[..., D:])
    gp = jnp.pad(g, ((0, 0), (P, P), (0, 0)))
    acc = jnp.zeros_like(g) + params["dw_b"]
    for kk in range(K):
        acc = acc + params["dw_w"][kk].reshape(1, 1, D) * gp[:, kk:kk + T, :]
    z = _swish(_layer_norm(acc, params["convnorm_g"], params["convnorm_b"]))
    z = mm(z, params["pw2_w"]) + params["pw2_b"]
    src = src + z.transpose(1, 0, 2)

    # 4. final FFN + final LayerNorm
    src = src + ffn(_layer_norm(src, params["ff_ln_g"], params["ff_ln_b"]),
                    params["ff_w1"], params["ff_b1"],
                    params["ff_w2"], params["ff_b2"])
    return _layer_norm(src, params["final_ln_g"], params["final_ln_b"])


# ----------------------------------- test ------------------------------------

if __name__ == "__main__":
    T, B = 8, 2
    d_model, num_heads, dim_ff, cnn_kernel = 32, 4, 64, 3
    D, F, K = d_model, dim_ff, cnn_kernel
    Dh = D // num_heads
    N = 2 * T - 1

    keys = iter(jax.random.split(jax.random.PRNGKey(0), 40))

    def w(shape, scale=0.1):
        return (scale * jax.random.normal(next(keys), shape)).astype(jnp.float32)

    def gain(shape):
        return (1.0 + 0.1 * jax.random.normal(next(keys), shape)).astype(jnp.float32)

    params = {
        "num_heads": num_heads,
        "cnn_kernel": K,
        # macaron FFN
        "ffmac_ln_g": gain((1, D)), "ffmac_ln_b": w((1, D)),
        "ffmac_w1": w((D, F)), "ffmac_b1": w((1, F)),
        "ffmac_w2": w((F, D)), "ffmac_b2": w((1, D)),
        # attention
        "mha_ln_g": gain((1, D)), "mha_ln_b": w((1, D)),
        "w_in": w((D, 3 * D)), "b_in": w((1, 3 * D)),
        "w_pos": w((D, D)),
        "pos_bias_u": w((num_heads, Dh)), "pos_bias_v": w((num_heads, Dh)),
        "w_out": w((D, D)), "b_out": w((1, D)),
        # conv module
        "conv_ln_g": gain((1, D)), "conv_ln_b": w((1, D)),
        "pw1_w": w((D, 2 * D)), "pw1_b": w((1, 2 * D)),
        "dw_w": w((K, D)), "dw_b": w((1, D)),
        "convnorm_g": gain((1, D)), "convnorm_b": w((1, D)),
        "pw2_w": w((D, D)), "pw2_b": w((1, D)),
        # final FFN + final norm
        "ff_ln_g": gain((1, D)), "ff_ln_b": w((1, D)),
        "ff_w1": w((D, F)), "ff_b1": w((1, F)),
        "ff_w2": w((F, D)), "ff_b2": w((1, D)),
        "final_ln_g": gain((1, D)), "final_ln_b": w((1, D)),
    }

    src = jax.random.normal(next(keys), (T, B, D), dtype=jnp.float32)
    pos_emb = jax.random.normal(next(keys), (1, N, D), dtype=jnp.float32)
    key_padding_mask = jnp.zeros((B, T), dtype=bool).at[1, T - 1].set(True)

    out = transformer_encoder_layer(src, pos_emb, params, key_padding_mask)
    out = jax.block_until_ready(out)

    ref = _reference_forward(src, pos_emb, params, key_padding_mask)

    assert out.shape == (T, B, D)
    assert bool(jnp.all(jnp.isfinite(out)))
    err = float(jnp.max(jnp.abs(out - ref)))
    assert jnp.allclose(out, ref, atol=1e-3, rtol=1e-3), f"max abs err {err}"

    print("KERNEL_OK")
</pallas_src>

<mosaic_0001>
module attributes {stable_mosaic.version = 11 : i64} {
  func.func @kernel(%arg0: i32, %arg1: memref<16x32xf32, #tpu.memory_space<vmem>>, %arg2: memref<1x32xf32, #tpu.memory_space<vmem>>, %arg3: memref<1x32xf32, #tpu.memory_space<vmem>>, %arg4: memref<32x64xf32, #tpu.memory_space<vmem>>, %arg5: memref<1x64xf32, #tpu.memory_space<vmem>>, %arg6: memref<64x32xf32, #tpu.memory_space<vmem>>, %arg7: memref<1x32xf32, #tpu.memory_space<vmem>>, %arg8: memref<16x32xf32, #tpu.memory_space<vmem>>) attributes {dimension_semantics = [#tpu.dimension_semantics<parallel>], iteration_bounds = array<i64: 1>, scalar_prefetch = 0 : i64, scratch_operands = 0 : i64, tpu.core_type = #tpu.core_type<tc>, window_params = [{transform_indices = @transform_0, window_bounds = array<i64: 16, 32>}, {pipeline_mode = #tpu.pipeline_mode<synchronous>, transform_indices = @transform_1, window_bounds = array<i64: 1, 32>}, {pipeline_mode = #tpu.pipeline_mode<synchronous>, transform_indices = @transform_2, window_bounds = array<i64: 1, 32>}, {pipeline_mode = #tpu.pipeline_mode<synchronous>, transform_indices = @transform_3, window_bounds = array<i64: 32, 64>}, {pipeline_mode = #tpu.pipeline_mode<synchronous>, transform_indices = @transform_4, window_bounds = array<i64: 1, 64>}, {pipeline_mode = #tpu.pipeline_mode<synchronous>, transform_indices = @transform_5, window_bounds = array<i64: 64, 32>}, {pipeline_mode = #tpu.pipeline_mode<synchronous>, transform_indices = @transform_6, window_bounds = array<i64: 1, 32>}, {transform_indices = @transform_7, window_bounds = array<i64: 16, 32>}]} {
    %c0 = arith.constant 0 : index
    %c0_0 = arith.constant 0 : index
    %0 = vector.load %arg1[%c0, %c0_0] : memref<16x32xf32, #tpu.memory_space<vmem>>, vector<16x32xf32>
    %c0_1 = arith.constant 0 : index
    %c0_2 = arith.constant 0 : index
    %1 = vector.load %arg2[%c0_1, %c0_2] : memref<1x32xf32, #tpu.memory_space<vmem>>, vector<1x32xf32>
    %c0_3 = arith.constant 0 : index
    %c0_4 = arith.constant 0 : index
    %2 = vector.load %arg3[%c0_3, %c0_4] : memref<1x32xf32, #tpu.memory_space<vmem>>, vector<1x32xf32>
    %cst = arith.constant dense<0.000000e+00> : vector<16xf32>
    %3 = vector.multi_reduction <add>, %0, %cst [1] : vector<16x32xf32> to vector<16xf32>
    %4 = vector.shape_cast %3 : vector<16xf32> to vector<16x1xf32>
    %cst_5 = arith.constant 3.200000e+01 : f32
    %5 = vector.broadcast %cst_5 : f32 to vector<16x1xf32>
    %6 = arith.divf %4, %5 : vector<16x1xf32>
    %7 = vector.broadcast %6 : vector<16x1xf32> to vector<16x32xf32>
    %8 = arith.subf %0, %7 : vector<16x32xf32>
    %9 = arith.mulf %8, %8 : vector<16x32xf32>
    %cst_6 = arith.constant dense<0.000000e+00> : vector<16xf32>
    %10 = vector.multi_reduction <add>, %9, %cst_6 [1] : vector<16x32xf32> to vector<16xf32>
    %11 = vector.shape_cast %10 : vector<16xf32> to vector<16x1xf32>
    %cst_7 = arith.constant 3.200000e+01 : f32
    %12 = vector.broadcast %cst_7 : f32 to vector<16x1xf32>
    %13 = arith.divf %11, %12 : vector<16x1xf32>
    %14 = vector.broadcast %6 : vector<16x1xf32> to vector<16x32xf32>
    %15 = arith.subf %0, %14 : vector<16x32xf32>
    %cst_8 = arith.constant 9.99999974E-6 : f32
    %16 = vector.broadcast %cst_8 : f32 to vector<16x1xf32>
    %17 = arith.addf %13, %16 : vector<16x1xf32>
    %18 = math.rsqrt %17 : vector<16x1xf32>
    %19 = vector.broadcast %18 : vector<16x1xf32> to vector<16x32xf32>
    %20 = arith.mulf %15, %19 : vector<16x32xf32>
    %21 = vector.broadcast %1 : vector<1x32xf32> to vector<16x32xf32>
    %22 = arith.mulf %20, %21 : vector<16x32xf32>
    %23 = vector.broadcast %2 : vector<1x32xf32> to vector<16x32xf32>
    %24 = arith.addf %22, %23 : vector<16x32xf32>
    %c0_9 = arith.constant 0 : index
    %c0_10 = arith.constant 0 : index
    %25 = vector.load %arg4[%c0_9, %c0_10] : memref<32x64xf32, #tpu.memory_space<vmem>>, vector<32x64xf32>
    %cst_11 = arith.constant dense<0.000000e+00> : vector<16x64xf32>
    %26 = tpu.matmul %24, %25, %cst_11 {dimension_numbers = #tpu.dot_dimension_numbers<[1], [0], [0], [1], [0, 0, 1, 1], [], []>, precision = #tpu.contract_precision<fp32>} : vector<16x32xf32>, vector<32x64xf32>, vector<16x64xf32> -> vector<16x64xf32>
    %c0_12 = arith.constant 0 : index
    %c0_13 = arith.constant 0 : index
    %27 = vector.load %arg5[%c0_12, %c0_13] : memref<1x64xf32, #tpu.memory_space<vmem>>, vector<1x64xf32>
    %28 = vector.broadcast %27 : vector<1x64xf32> to vector<16x64xf32>
    %29 = arith.addf %26, %28 : vector<16x64xf32>
    %cst_14 = arith.constant 0.000000e+00 : f32
    %30 = vector.broadcast %cst_14 : f32 to vector<16x64xf32>
    %31 = arith.subf %30, %29 : vector<16x64xf32>
    %32 = math.exp %31 : vector<16x64xf32>
    %cst_15 = arith.constant 1.000000e+00 : f32
    %33 = vector.broadcast %cst_15 : f32 to vector<16x64xf32>
    %34 = arith.addf %33, %32 : vector<16x64xf32>
    %cst_16 = arith.constant 1.000000e+00 : f32
    %35 = vector.broadcast %cst_16 : f32 to vector<16x64xf32>
    %36 = arith.divf %35, %34 : vector<16x64xf32>
    %37 = arith.mulf %29, %36 : vector<16x64xf32>
    %c0_17 = arith.constant 0 : index
    %c0_18 = arith.constant 0 : index
    %38 = vector.load %arg6[%c0_17, %c0_18] : memref<64x32xf32, #tpu.memory_space<vmem>>, vector<64x32xf32>
    %cst_19 = arith.constant dense<0.000000e+00> : vector<16x32xf32>
    %39 = tpu.matmul %37, %38, %cst_19 {dimension_numbers = #tpu.dot_dimension_numbers<[1], [0], [0], [1], [0, 0, 1, 1], [], []>, precision = #tpu.contract_precision<fp32>} : vector<16x64xf32>, vector<64x32xf32>, vector<16x32xf32> -> vector<16x32xf32>
    %c0_20 = arith.constant 0 : index
    %c0_21 = arith.constant 0 : index
    %40 = vector.load %arg7[%c0_20, %c0_21] : memref<1x32xf32, #tpu.memory_space<vmem>>, vector<1x32xf32>
    %41 = vector.broadcast %40 : vector<1x32xf32> to vector<16x32xf32>
    %42 = arith.addf %39, %41 : vector<16x32xf32>
    %cst_22 = arith.constant 5.000000e-01 : f32
    %43 = vector.broadcast %cst_22 : f32 to vector<16x32xf32>
    %44 = arith.mulf %43, %42 : vector<16x32xf32>
    %45 = arith.addf %0, %44 : vector<16x32xf32>
    %c0_23 = arith.constant 0 : index
    %c0_24 = arith.constant 0 : index
    %46 = vector.load %arg8[%c0_23, %c0_24] : memref<16x32xf32, #tpu.memory_space<vmem>>, vector<16x32xf32>
    tpu.vector_store %arg8[%c0_23, %c0_24], %45 {strides = array<i32>} : memref<16x32xf32, #tpu.memory_space<vmem>>, vector<16x32xf32>,
    return
  }
  func.func @transform_0(%arg0: i32) -> (i32, i32) {
    %c0_i32 = arith.constant 0 : i32
    %c0_i32_0 = arith.constant 0 : i32
    return %arg0, %c0_i32 : i32, i32
  }
  func.func @transform_1(%arg0: i32) -> (i32, i32) {
    %c0_i32 = arith.constant 0 : i32
    %c0_i32_0 = arith.constant 0 : i32
    %c0_i32_1 = arith.constant 0 : i32
    return %c0_i32, %c0_i32_0 : i32, i32
  }
  func.func @transform_2(%arg0: i32) -> (i32, i32) {
    %c0_i32 = arith.constant 0 : i32
    %c0_i32_0 = arith.constant 0 : i32
    %c0_i32_1 = arith.constant 0 : i32
    return %c0_i32, %c0_i32_0 : i32, i32
  }
  func.func @transform_3(%arg0: i32) -> (i32, i32) {
    %c0_i32 = arith.constant 0 : i32
    %c0_i32_0 = arith.constant 0 : i32
    %c0_i32_1 = arith.constant 0 : i32
    return %c0_i32, %c0_i32_0 : i32, i32
  }
  func.func @transform_4(%arg0: i32) -> (i32, i32) {
    %c0_i32 = arith.constant 0 : i32
    %c0_i32_0 = arith.constant 0 : i32
    %c0_i32_1 = arith.constant 0 : i32
    return %c0_i32, %c0_i32_0 : i32, i32
  }
  func.func @transform_5(%arg0: i32) -> (i32, i32) {
    %c0_i32 = arith.constant 0 : i32
    %c0_i32_0 = arith.constant 0 : i32
    %c0_i32_1 = arith.constant 0 : i32
    return %c0_i32, %c0_i32_0 : i32, i32
  }
  func.func @transform_6(%arg0: i32) -> (i32, i32) {
    %c0_i32 = arith.constant 0 : i32
    %c0_i32_0 = arith.constant 0 : i32
    %c0_i32_1 = arith.constant 0 : i32
    return %c0_i32, %c0_i32_0 : i32, i32
  }
  func.func @transform_7(%arg0: i32) -> (i32, i32) {
    %c0_i32 = arith.constant 0 : i32
    %c0_i32_0 = arith.constant 0 : i32
    return %arg0, %c0_i32 : i32, i32
  }
}

</mosaic_0001>

<bundles_post_ra>
// kernel: tpu_custom_call.1
= control target key start
LH: loop header
LB: loop body
LE: loop exit
PB: predicated region body
PF: predicated region fallthrough
CT: control target
= control target key end

     0   :  { %vm31_vm0 = vcmask 261120   ;;  %s1960_s0 = inlined_call_operand.vmem [shape: f32[16,32], index: 0, kind: input, shape index: {}]   ;;  %s1961_s1 = inlined_call_operand.vmem [shape: f32[1,32], index: 1, kind: input, shape index: {}]   ;;  %s1962_s2 = inlined_call_operand.vmem [shape: f32[1,32], index: 2, kind: input, shape index: {}]   ;;  %s1963_s3 = inlined_call_operand.vmem [shape: f32[32,64], index: 3, kind: input, shape index: {}]   ;;  %s1964_s4 = inlined_call_operand.vmem [shape: f32[1,64], index: 4, kind: input, shape index: {}]   ;;  %s1965_s5 = inlined_call_operand.vmem [shape: f32[64,32], index: 5, kind: input, shape index: {}]   ;;  %s1966_s6 = inlined_call_operand.vmem [shape: f32[1,32], index: 6, kind: input, shape index: {}]   ;;  %s1967_s7 = inlined_call_operand.hbm [shape: f32[16,32], index: 7, kind: output, shape index: {}]  }
   0x1   :  { %v1791_v0 = vld [vmem:[%s1960_s0] sm:$0xff]  ;;  %v1796_v1 = vld [vmem:[%s1960_s0 + $0x8] sm:$0xff] }
   0x2   :  { %12 = vsyncpa [#allocation3], 0  ;;  %v32_v2 = vsel %vm31_vm0, %v1791_v0, 0.0  ;;  %v35_v3 = vsel %vm31_vm0, %v1796_v1, 0.0  ;;  %v75_v14 = vld [vmem:[%s1963_s3] sm:$0xff]  ;;  %v76_v15 = vld [vmem:[%s1963_s3 + $0x8] sm:$0xff] }
   0x3   :  { %33 = vadd.xlane.f32.xlu0 %v32_v2  ;;  %v77_v16 = vld [vmem:[%s1963_s3 + $0x10] sm:$0xff]  ;;  %v93_v17 = vand.u32 4294901760, %v75_v14  ;;  %v96_v18 = vand.u32 4294901760, %v76_v15  ;;  %v78_v19 = vld [vmem:[%s1963_s3 + $0x18] sm:$0xff]  ;;  %v1258_v53 = vld [vmem:[%s1961_s1] ss:$0 sm:$0xff] }
   0x4   :  { %v99_v20 = vand.u32 4294901760, %v77_v16  ;;  %v102_v21 = vand.u32 4294901760, %v78_v19  ;;  %v1259_v55 = vld [vmem:[%s1962_s2] ss:$0 sm:$0xff]  ;;  %vm649_vm1 = vcmask 523264   ;;  %s1745_s30 = smov [#allocation2]  }
   0x5   :  { %v1818_v22 = vpack.c.bf16 %v96_v18, %v93_v17  ;;  %v183_v24 = vsub.f32 %v75_v14, %v93_v17  ;;  %v190_v25 = vsub.f32 %v76_v15, %v96_v18  ;;  %v636_v18 = vld [vmem:[%s1965_s5 + $0x10] sm:$0xff]  ;;  %s1247_s8 = sshll.u32 %s1745_s30, 4  ;;  %s1248_s8 = int_to_ptr.vmem [resolvable:$true] %s1247_s8 }
   0x6   :  { %v1820_v23 = vpack.c.bf16 %v102_v21, %v99_v20  ;;  %v197_v30 = vsub.f32 %v77_v16, %v99_v20  ;;  %v204_v31 = vsub.f32 %v78_v19, %v102_v21  ;;  %v637_v19 = vld [vmem:[%s1965_s5 + $0x18] sm:$0xff]  ;;  %p1726_p1 = scmp.lt.s32.totalorder %s1248_s8, %s1248_s8 }
   0x7   :  { %36 = vadd.xlane.f32.xlu0 %v35_v3  ;;  %1539 = vmatprep.subr.bf16.mxu0 %v1818_v22  ;;  %v184_v26 = vand.u32 4294901760, %v183_v24  ;;  %v191_v27 = vand.u32 4294901760, %v190_v25  ;;  %v1554_v42 = vpack.c.bf16 %v190_v25, %v183_v24 }
   0x8   :  { %1541 = vmatpush3.bf16.msra.mxu0 %v1818_v22  ;;  %v198_v34 = vand.u32 4294901760, %v197_v30  ;;  %v205_v35 = vand.u32 4294901760, %v204_v31  ;;  %v1558_v43 = vpack.c.bf16 %v204_v31, %v197_v30 }
   0x9   :  { %1543 = vmatprep.subr.bf16.mxu0 %v1820_v23  ;;  %v185_v28 = vsub.f32 %v183_v24, %v184_v26  ;;  %v192_v29 = vsub.f32 %v190_v25, %v191_v27  ;;  %v1570_v44 = vpack.c.bf16 %v191_v27, %v184_v26 }
   0xa   :  { %v199_v37 = vsub.f32 %v197_v30, %v198_v34  ;;  %v206_v38 = vsub.f32 %v204_v31, %v205_v35  ;;  %v1574_v45 = vpack.c.bf16 %v205_v35, %v198_v34 }
   0xb   :  { %v186_v32 = vand.u32 4294901760, %v185_v28  ;;  %v193_v33 = vand.u32 4294901760, %v192_v29  ;;  %v638_v28 = vld [vmem:[%s1965_s5 + $0x20] sm:$0xff]  ;;  %v639_v29 = vld [vmem:[%s1965_s5 + $0x28] sm:$0xff] }
   0xc   :  { %1545 = vmatpush3.bf16.msra.mxu0 %v1820_v23  ;;  %v200_v39 = vand.u32 4294901760, %v199_v37  ;;  %v207_v40 = vand.u32 4294901760, %v206_v38  ;;  %v669_v34 = vand.u32 4294901760, %v638_v28  ;;  %v672_v35 = vand.u32 4294901760, %v639_v29 }
   0xd   :  { %v1546_v36 = vpack.c.bf16 %v193_v33, %v186_v32 }
   0xe   :  { %v1550_v41 = vpack.c.bf16 %v207_v40, %v200_v39  ;;  %v779_v39 = vsub.f32 %v638_v28, %v669_v34  ;;  %v786_v40 = vsub.f32 %v639_v29, %v672_v35 }
   0xf   :  { %1547 = vmatprep.subr.bf16.mxu0 %v1546_v36 }
  0x90   :  { %v34_v4 = vpop.xlane.xlu0 %33 }
  0x91   :  { %v39_v5 = vmul.f32 0.03125, %v34_v4 }
  0x93   :  { %v41_v6 = vsub.f32 %v1791_v0, %v39_v5 }
  0x94   :  { %v37_v7 = vpop.xlane.xlu0 %36 }
  0x95   :  { %v40_v8 = vmul.f32 0.03125, %v37_v7  ;;  %v43_v9 = vmul.f32 %v41_v6, %v41_v6 }
  0x97   :  { %v42_v10 = vsub.f32 %v1796_v1, %v40_v8  ;;  %v45_v11 = vsel %vm31_vm0, %v43_v9, 0.0 }
  0x98   :  { %46 = vadd.xlane.f32.xlu1 %v45_v11 }
  0x99   :  { %v44_v12 = vmul.f32 %v42_v10, %v42_v10 }
  0x9b   :  { %v48_v13 = vsel %vm31_vm0, %v44_v12, 0.0 }
  0x9c   :  { %49 = vadd.xlane.f32.xlu1 %v48_v13  ;;  %v635_v13 = vld [vmem:[%s1965_s5 + $0x8] sm:$0xff] }
  0x9d   :  { %v660_v15 = vand.u32 4294901760, %v635_v13 }
  0x9f   :  { %v1850_v17 = vsub.f32 %v635_v13, %v660_v15 }
  0xa1   :  { %v759_v21 = vand.u32 4294901760, %v1850_v17 }
  0xa3   :  { %v760_v25 = vsub.f32 %v1850_v17, %v759_v21 }
  0xa5   :  { %v761_v31 = vand.u32 4294901760, %v760_v25 }
 0x125   :  { %v47_v46 = vpop.xlane.xlu1 %46 }
 0x126   :  { %v51_v47 = vmul.f32 0.03125, %v47_v46 }
 0x128   :  { %v53_v48 = vadd.f32 1e-05, %v51_v47  ;;  %v780_v47 = vand.u32 4294901760, %v779_v39 }
 0x129   :  { %v50_v49 = vpop.xlane.xlu1 %49 }
 0x12a   :  { %1709 = vrsqrt.f32 %v53_v48  ;;  %v52_v50 = vmul.f32 0.03125, %v50_v49  ;;  %v787_v48 = vand.u32 4294901760, %v786_v40 }
 0x12c   :  { %v54_v51 = vadd.f32 1e-05, %v52_v50 }
 0x12e   :  { %1711 = vrsqrt.f32 %v54_v51 }
 0x134   :  { %v1710_v52 = vpop.eup %1709 }
 0x135   :  { %v57_v54 = vmul.f32 %v1710_v52, %v41_v6  ;;  %v781_v52 = vsub.f32 %v779_v39, %v780_v47 }
 0x137   :  { %v65_v56 = vmul.f32 %v1258_v53, %v57_v54 }
 0x138   :  { %v1712_v57 = vpop.eup %1711 }
 0x139   :  { %v58_v58 = vmul.f32 %v1712_v57, %v42_v10  ;;  %v73_v59 = vadd.f32 %v1259_v55, %v65_v56  ;;  %v634_v10 = vld [vmem:[%s1965_s5] sm:$0xff]  ;;  %v782_v56 = vand.u32 4294901760, %v781_v52 }
 0x13a   :  { %v657_v14 = vand.u32 4294901760, %v634_v10 }
 0x13b   :  { %v66_v60 = vmul.f32 %v1258_v53, %v58_v58  ;;  %v87_v61 = vsel %vm31_vm0, %v73_v59, 0  ;;  %v788_v53 = vsub.f32 %v786_v40, %v787_v48 }
 0x13c   :  { %v161_v62 = vand.u32 4294901760, %v87_v61  ;;  %v1848_v16 = vsub.f32 %v634_v10, %v657_v14  ;;  %v1912_v10 = vpack.c.bf16 %v787_v48, %v780_v47 }
 0x13d   :  { %v74_v63 = vadd.f32 %v1259_v55, %v66_v60  ;;  %v789_v57 = vand.u32 4294901760, %v788_v53  ;;  %v1886_v60 = vpack.c.bf16 %v660_v15, %v657_v14  ;;  %v1260_v14 = vld [vmem:[%s1964_s4] ss:$0 sm:$0xff] }
 0x13e   :  { %v162_v2 = vsub.f32 %v87_v61, %v161_v62  ;;  %v752_v20 = vand.u32 4294901760, %v1848_v16 }
 0x13f   :  { %v90_v3 = vsel %vm31_vm0, %v74_v63, 0  ;;  %v1610_v61 = vpack.c.bf16 %v789_v57, %v782_v56 }
 0x140   :  { %v163_v4 = vand.u32 4294901760, %v162_v2  ;;  %v171_v5 = vand.u32 4294901760, %v90_v3  ;;  %v753_v24 = vsub.f32 %v1848_v16, %v752_v20 }
 0x142   :  { %v164_v7 = vsub.f32 %v162_v2, %v163_v4  ;;  %v172_v6 = vsub.f32 %v90_v3, %v171_v5  ;;  %v754_v30 = vand.u32 4294901760, %v753_v24 }
 0x144   :  { %v165_v8 = vand.u32 4294901760, %v164_v7  ;;  %v173_v9 = vand.u32 4294901760, %v172_v6 }
 0x146   :  { %1366 = vmatprep.mubr.f32.mxu0 %v165_v8  ;;  %v174_v11 = vsub.f32 %v172_v6, %v173_v9  ;;  %v1626_v8 = vpack.c.bf16 %v786_v40, %v779_v39 }
 0x148   :  { %v175_v12 = vand.u32 4294901760, %v174_v11  ;;  %v1650_v11 = vpack.c.bf16 %v759_v21, %v752_v20 }
 0x14a   :  { %1367 = vmatmul.mubr.f32.vlgmr.msra.gmra.mrb[0].mxu0 %v175_v12 }
 0x14b   :  { %1549 = vmatpush3.bf16.msra.mxu0 %v1546_v36  ;;  %1377 = vmatprep.mubr.f32.mxu0 %v161_v62  ;;  %v1602_v36 = vpack.c.bf16 %v761_v31, %v754_v30 }
 0x14c   :  { %1551 = vmatprep.subr.bf16.mxu0 %v1550_v41 }
 0x14d   :  { %1603 = vmatprep.subr.bf16.mxu1 %v1602_v36 }
 0x14e   :  { %1605 = vmatpush3.bf16.msra.mxu1 %v1602_v36 }
 0x14f   :  { %1553 = vmatpush3.bf16.msra.mxu0 %v1550_v41  ;;  %v640_v41 = vld [vmem:[%s1965_s5 + $0x30] sm:$0xff] }
 0x150   :  { %1555 = vmatprep.subr.bf16.mxu0 %v1554_v42 }
 0x152   :  { %1378 = vmatmul.mubr.f32.vlgmr.msra.gmra.mrb[0].mxu0 %v171_v5 }
 0x153   :  { %1557 = vmatpush3.bf16.msra.mxu0 %v1554_v42  ;;  %1388 = vmatprep.mubr.f32.mxu0 %v162_v2  ;;  %v641_v42 = vld [vmem:[%s1965_s5 + $0x38] sm:$0xff] }
 0x154   :  { %1559 = vmatprep.subr.bf16.mxu0 %v1558_v43  ;;  %v678_v46 = vand.u32 4294901760, %v641_v42 }
 0x156   :  { %v800_v51 = vsub.f32 %v641_v42, %v678_v46 }
 0x157   :  { %1561 = vmatpush3.bf16.msra.mxu0 %v1558_v43 }
 0x158   :  { %1563 = vmatprep.subr.bf16.mxu0 %v1818_v22  ;;  %v801_v55 = vand.u32 4294901760, %v800_v51 }
 0x15a   :  { %1389 = vmatmul.mubr.f32.vlgmr.msra.gmra.mrb[0].mxu0 %v172_v6  ;;  %v802_v59 = vsub.f32 %v800_v51, %v801_v55 }
 0x15b   :  { %1565 = vmatpush3.bf16.msra.mxu0 %v1818_v22  ;;  %1399 = vmatprep.mubr.f32.mxu0 %v163_v4  ;;  %v1618_v4 = vpack.c.bf16 %v1850_v17, %v1848_v16 }
 0x15c   :  { %1567 = vmatprep.subr.bf16.mxu0 %v1820_v23  ;;  %v803_v63 = vand.u32 4294901760, %v802_v59 }
 0x15f   :  { %1569 = vmatpush3.bf16.msra.mxu0 %v1820_v23 }
 0x160   :  { %1571 = vmatprep.subr.bf16.mxu0 %v1570_v44 }
 0x162   :  { %1400 = vmatmul.mubr.f32.vlgmr.msra.gmra.mrb[0].mxu0 %v173_v9 }
 0x163   :  { %1573 = vmatpush3.bf16.msra.mxu0 %v1570_v44  ;;  %1410 = vmatprep.mubr.f32.mxu0 %v161_v62 }
 0x164   :  { %1575 = vmatprep.subr.bf16.mxu0 %v1574_v45 }
 0x167   :  { %1577 = vmatpush3.bf16.msra.mxu0 %v1574_v45  ;;  %v675_v45 = vand.u32 4294901760, %v640_v41 }
 0x168   :  { %1579 = vmatprep.subr.bf16.mxu0 %v1818_v22 }
 0x169   :  { %v793_v50 = vsub.f32 %v640_v41, %v675_v45  ;;  %v1898_v7 = vpack.c.bf16 %v678_v46, %v675_v45  ;;  %v1261_v45 = vld [vmem:[%s1966_s6] ss:$0 sm:$0xff]  ;;  %s1721_s6 = scalar_lea.vmem %s1248_s8, 256 }
 0x16a   :  { %1411 = vmatmul.mubr.f32.vlgmr.msra.gmra.mrb[0].mxu0 %v171_v5  ;;  %p1722_p0 = scmp.ne.s32.totalorder %s1248_s8, %s1721_s6  ;;  %p1727_p2 = scmp.lt.s32.totalorder %s1721_s6, %s1721_s6 }
 0x16b   :  { %1581 = vmatpush3.bf16.msra.mxu0 %v1818_v22  ;;  %1421 = vmatprep.mubr.f32.mxu0 %v161_v62  ;;  %v663_v22 = vand.u32 4294901760, %v636_v18  ;;  %v794_v54 = vand.u32 4294901760, %v793_v50  ;;  %v1630_v9 = vpack.c.bf16 %v800_v51, %v793_v50 }
 0x16c   :  { %1583 = vmatprep.subr.bf16.mxu0 %v1820_v23  ;;  %p1728_p3 = por %p1727_p2, %p1726_p1 }
 0x16d   :  { %v1866_v26 = vsub.f32 %v636_v18, %v663_v22  ;;  %v795_v58 = vsub.f32 %v793_v50, %v794_v54  ;;  %v1914_v13 = vpack.c.bf16 %v801_v55, %v794_v54 }
 0x16e   :  { %p1729_p4 = pnand %p1728_p3, %p1722_p0 }
 0x16f   :  { %1585 = vmatpush3.bf16.msra.mxu0 %v1820_v23  ;;  %v666_v23 = vand.u32 4294901760, %v637_v19  ;;  %v766_v32 = vand.u32 4294901760, %v1866_v26  ;;  %v796_v62 = vand.u32 4294901760, %v795_v58 }
 0x170   :  { %1587 = vmatprep.subr.bf16.mxu0 %v1886_v60 }
 0x171   :  { %v1868_v27 = vsub.f32 %v637_v19, %v666_v23  ;;  %v767_v37 = vsub.f32 %v1866_v26, %v766_v32  ;;  %v1614_v2 = vpack.c.bf16 %v803_v63, %v796_v62  ;;  %v1890_v3 = vpack.c.bf16 %v666_v23, %v663_v22 }
 0x172   :  { %1422 = vmatmul.mubr.f32.vlgmr.msra.gmra.mrb[0].mxu0 %v171_v5  ;;  %v1896_v5 = vpack.c.bf16 %v672_v35, %v669_v34 }
 0x173   :  { %v773_v33 = vand.u32 4294901760, %v1868_v27  ;;  %v768_v43 = vand.u32 4294901760, %v767_v37  ;;  %1589 = vmatpush3.bf16.msra.mxu0 %v1886_v60  ;;  %v1622_v6 = vpack.c.bf16 %v1868_v27, %v1866_v26 }
 0x174   :  { %1591 = vmatprep.subr.bf16.mxu0 %v1890_v3 }
 0x175   :  { %v774_v38 = vsub.f32 %v1868_v27, %v773_v33  ;;  %v1910_v12 = vpack.c.bf16 %v773_v33, %v766_v32 }
 0x177   :  { %v775_v44 = vand.u32 4294901760, %v774_v38  ;;  %1593 = vmatpush3.bf16.msra.mxu0 %v1890_v3 }
 0x178   :  { %1595 = vmatprep.subr.bf16.mxu0 %v1896_v5 }
 0x179   :  { %v1606_v49 = vpack.c.bf16 %v775_v44, %v768_v43 }
 0x17b   :  { %1607 = vmatprep.subr.bf16.mxu1 %v1606_v49  ;;  %1597 = vmatpush3.bf16.msra.mxu0 %v1896_v5 }
 0x17c   :  { %1609 = vmatpush3.bf16.msra.mxu1 %v1606_v49  ;;  %1599 = vmatprep.subr.bf16.mxu0 %v1898_v7 }
 0x17d   :  { %1611 = vmatprep.subr.bf16.mxu1 %v1610_v61 }
 0x17f   :  { %1601 = vmatpush3.bf16.msra.mxu0 %v1898_v7 }
 0x180   :  { %1613 = vmatpush3.bf16.msra.mxu1 %v1610_v61 }
 0x181   :  { %1615 = vmatprep.subr.bf16.mxu1 %v1614_v2 }
 0x184   :  { %1617 = vmatpush3.bf16.msra.mxu1 %v1614_v2 }
 0x185   :  { %1619 = vmatprep.subr.bf16.mxu1 %v1618_v4 }
 0x245   :  { %v1423_v15 = vpop.f32.mrb[0].mxu0 }
 0x246   :  { %v1682_v18 = vadd.f32 %v1423_v15, %v1260_v14  ;;  %v610_v19 = vpop.f32.mrb[1].mxu0 }
 0x247   :  { %v1683_v22 = vadd.f32 %v1260_v14, %v610_v19 }
 0x248   :  { %v621_v23 = vsub.f32 0.0, %v1682_v18 }
 0x249   :  { %v620_v24 = vsub.f32 0.0, %v1683_v22 }
 0x24a   :  { %v624_v16 = vmul.f32 1.442695, %v621_v23 }
 0x24b   :  { %v622_v25 = vmul.f32 1.442695, %v620_v24 }
 0x24c   :  { %1713 = vpow2.f32 %v624_v16 }
 0x24d   :  { %1715 = vpow2.f32 %v622_v25 }
 0x256   :  { %v1714_v17 = vpop.eup %1713 }
 0x257   :  { %v1716_v20 = vpop.eup %1715  ;;  %v627_v21 = vadd.f32 1.0, %v1714_v17 }
 0x258   :  { %v626_v26 = vadd.f32 1.0, %v1716_v20 }
 0x259   :  { %1717 = vrcp.f32 %v627_v21 }
 0x25a   :  { %1719 = vrcp.f32 %v626_v26 }
 0x263   :  { %v1718_v27 = vpop.eup %1717 }
 0x264   :  { %v1720_v28 = vpop.eup %1719  ;;  %v633_v29 = vmul.f32 %v1718_v27, %v1682_v18 }
 0x265   :  { %v632_v30 = vmul.f32 %v1720_v28, %v1683_v22 }
 0x266   :  { %v654_v31 = vsel %vm649_vm1, %v633_v29, 0 }
 0x267   :  { %v739_v32 = vand.u32 4294901760, %v654_v31  ;;  %v651_v33 = vsel %vm649_vm1, %v632_v30, 0 }
 0x268   :  { %v729_v34 = vand.u32 4294901760, %v651_v33 }
 0x269   :  { %v740_v35 = vsub.f32 %v654_v31, %v739_v32 }
 0x26a   :  { %1459 = vmatprep.mubr.f32.mxu1 %v729_v34  ;;  %v730_v36 = vsub.f32 %v651_v33, %v729_v34 }
 0x26b   :  { %1460 = vmatmul.mubr.f32.vlgmr.msra.gmra.mrb[0].mxu1 %v739_v32  ;;  %v741_v37 = vand.u32 4294901760, %v740_v35 }
 0x26c   :  { %1621 = vmatpush3.bf16.msra.mxu1 %v1618_v4  ;;  %1478 = vmatprep.mubr.f32.mxu1 %v730_v36  ;;  %v731_v38 = vand.u32 4294901760, %v730_v36 }
 0x26d   :  { %1623 = vmatprep.subr.bf16.mxu1 %v1622_v6  ;;  %v742_v39 = vsub.f32 %v740_v35, %v741_v37 }
 0x26e   :  { %v732_v40 = vsub.f32 %v730_v36, %v731_v38 }
 0x26f   :  { %v743_v42 = vand.u32 4294901760, %v742_v39 }
 0x270   :  { %1625 = vmatpush3.bf16.msra.mxu1 %v1622_v6  ;;  %v733_v41 = vand.u32 4294901760, %v732_v40 }
 0x271   :  { %1627 = vmatprep.subr.bf16.mxu1 %v1626_v8 }
 0x272   :  { %1440 = vmatprep.mubr.f32.mxu0 %v733_v41 }
 0x273   :  { %1441 = vmatmul.mubr.f32.vlgmr.msra.gmra.mrb[2].mxu0 %v743_v42 }
 0x274   :  { %1629 = vmatpush3.bf16.msra.mxu1 %v1626_v8 }
 0x275   :  { %1631 = vmatprep.subr.bf16.mxu1 %v1630_v9 }
 0x278   :  { %1633 = vmatpush3.bf16.msra.mxu1 %v1630_v9 }
 0x279   :  { %1635 = vmatprep.subr.bf16.mxu1 %v1886_v60 }
 0x27b   :  { %1479 = vmatmul.mubr.f32.vlgmr.msra.gmra.mrb[0].mxu1 %v740_v35 }
 0x27c   :  { %1637 = vmatpush3.bf16.msra.mxu1 %v1886_v60  ;;  %1497 = vmatprep.mubr.f32.mxu1 %v731_v38 }
 0x27d   :  { %1639 = vmatprep.subr.bf16.mxu1 %v1890_v3 }
 0x280   :  { %1641 = vmatpush3.bf16.msra.mxu1 %v1890_v3 }
 0x281   :  { %1643 = vmatprep.subr.bf16.mxu1 %v1896_v5 }
 0x284   :  { %1645 = vmatpush3.bf16.msra.mxu1 %v1896_v5 }
 0x285   :  { %1647 = vmatprep.subr.bf16.mxu1 %v1898_v7 }
 0x288   :  { %1649 = vmatpush3.bf16.msra.mxu1 %v1898_v7 }
 0x289   :  { %1651 = vmatprep.subr.bf16.mxu1 %v1650_v11 }
 0x28b   :  { %1498 = vmatmul.mubr.f32.vlgmr.msra.gmra.mrb[0].mxu1 %v741_v37 }
 0x28c   :  { %1653 = vmatpush3.bf16.msra.mxu1 %v1650_v11  ;;  %1516 = vmatprep.mubr.f32.mxu1 %v729_v34 }
 0x28d   :  { %1655 = vmatprep.subr.bf16.mxu1 %v1910_v12 }
 0x290   :  { %1657 = vmatpush3.bf16.msra.mxu1 %v1910_v12 }
 0x291   :  { %1659 = vmatprep.subr.bf16.mxu1 %v1912_v10 }
 0x294   :  { %1661 = vmatpush3.bf16.msra.mxu1 %v1912_v10 }
 0x295   :  { %1663 = vmatprep.subr.bf16.mxu1 %v1914_v13 }
 0x298   :  { %1665 = vmatpush3.bf16.msra.mxu1 %v1914_v13 }
 0x299   :  { %1667 = vmatprep.subr.bf16.mxu1 %v1886_v60 }
 0x29b   :  { %1517 = vmatmul.mubr.f32.vlgmr.msra.gmra.mrb[0].mxu1 %v739_v32 }
 0x29c   :  { %1669 = vmatpush3.bf16.msra.mxu1 %v1886_v60  ;;  %1535 = vmatprep.mubr.f32.mxu1 %v729_v34 }
 0x29d   :  { %1671 = vmatprep.subr.bf16.mxu1 %v1890_v3 }
 0x2a0   :  { %1673 = vmatpush3.bf16.msra.mxu1 %v1890_v3 }
 0x2a1   :  { %1675 = vmatprep.subr.bf16.mxu1 %v1896_v5 }
 0x2a4   :  { %1677 = vmatpush3.bf16.msra.mxu1 %v1896_v5 }
 0x2a5   :  { %1679 = vmatprep.subr.bf16.mxu1 %v1898_v7 }
 0x2a8   :  { %1681 = vmatpush3.bf16.msra.mxu1 %v1898_v7 }
 0x2ab   :  { %1536 = vmatmul.mubr.f32.vlgmr.msra.gmra.mrb[0].mxu1 %v739_v32 }
 0x346   :  { %v1442_v43 = vpop.f32.mrb[2].mxu0 }
 0x347   :  { %v735_v44 = vpop.f32.mrb[3].mxu0  ;;  %v746_v46 = vadd.f32 %v1442_v43, %v1261_v45 }
 0x348   :  { %v736_v47 = vadd.f32 %v1261_v45, %v735_v44 }
 0x37e   :  { %v1537_v48 = vpop.f32.mrb[0].mxu1 }
 0x37f   :  { %v1685_v49 = vadd.f32 %v1537_v48, %v746_v46  ;;  %v1226_v50 = vpop.f32.mrb[1].mxu1 }
 0x380   :  { %v1687_v51 = vadd.f32 %v1226_v50, %v736_v47 }
 0x381   :  { %v1237_v52 = vmul.f32 0.5, %v1685_v49 }
 0x382   :  { %v1236_v53 = vmul.f32 0.5, %v1687_v51 }
 0x383   :  { %v1239_v54 = vadd.f32 %v1237_v52, %v1796_v1 }
 0x384   :  { %v1238_v55 = vadd.f32 %v1236_v53, %v1791_v0 }
 0x385   :  { %1241 = vst.msk [vmem:[#allocation2 + $0x8] sm:$0xff] %vm31_vm0, %v1239_v54 }
 0x386   :  { %1240 = vst.msk [vmem:[#allocation2] sm:$0xff] %vm31_vm0, %v1238_v55 }
 0x387   :  { %1732 = shalt.err (!%p1729_p4)
}
 0x388   :  { %s1733_s11 = scalar_lea.hbm %s1967_s7, 256 }
 0x389   :  { %p1734_p5 = scmp.ne.s32.totalorder %s1967_s7, %s1733_s11  ;;  %p1737_p6 = scmp.lt.u32.totalorder %s1733_s11, %s1967_s7 }
 0x38b   :  { %p1739_p7 = pnand %p1737_p6, %p1734_p5 }
 0x38d   :  { %1742 = shalt.err (!%p1739_p7)
}
 0x38e   :  { %s1746_s1 = smov 128   ;;  %s1747_s2 = smov 8  }
 0x38f   :  { %1253 = dma.vmem_to_hbm [thread:$0]  %s1248_s8, 256, %s1967_s7, [#allocation3], %s1746_s1, %s1746_s1, %s1747_s2  }
 0x390   :  { %1743 = dma.done.wait [#allocation3], 256  }
 0x391   :  { %1744 = vsyncadd [#allocation3], 4294967040 }
 0x392   :  { %1257 = vsyncpa [#allocation3], 1 }

</bundles_post_ra>
